<compile_context>
chip_gen: v6e
topology: v6e:2x2x1
jax: 0.10.0
libtpu: 0.0.40
codegen_flags: <defaults>
</compile_context>

<pallas_src>
import functools
import math

import jax
import jax.numpy as jnp
from jax import lax
from jax.experimental import pallas as pl
from jax.experimental.pallas import tpu as pltpu


def _diffusion_l1_kernel(sac_ref, som_ref,              # SMEM (scalar prefetch, per batch)
                         x_ref, eps_ref, w_ref, b_ref,  # VMEM inputs
                         part_ref,                      # VMEM output (CK, 128)
                         *, CK, TILE_N, CHUNK):
    b = pl.program_id(0)
    sa = sac_ref[b]            # sqrt(alpha_cum)
    so = som_ref[b]            # sqrt(1 - alpha_cum)

    W = w_ref[...]             # (CK, CK) folded channel-mix weight
    bias = b_ref[...]          # (CK, 1)

    nfold = CHUNK // 128
    nchunk = TILE_N // CHUNK

    def body(m, psum):
        off = m * CHUNK
        xs = x_ref[:, pl.ds(off, CHUNK)]                      # (CK, CHUNK)
        es = eps_ref[:, pl.ds(off, CHUNK)]
        z = sa * xs + so * es                                 # q_sample / get_z_t
        recon = jnp.dot(W, z, preferred_element_type=jnp.float32,
                        precision=lax.Precision.HIGHEST) + bias   # synthetic denoise_fn
        d = jnp.abs(xs - recon)                               # |x - x_recon|
        fold = d[:, 0:128]                                    # fold lanes down to 128
        for i in range(1, nfold):
            fold = fold + d[:, i * 128:(i + 1) * 128]
        return psum + fold

    psum = lax.fori_loop(0, nchunk, body, jnp.zeros((CK, 128), jnp.float32))
    part_ref[...] = psum


def _largest_div_multiple_of_128(n, cap):
    """Largest multiple of 128 that divides n and is <= cap (n must be a multiple of 128)."""
    t = max(128, (min(cap, n) // 128) * 128)
    while n % t != 0:
        t -= 128
    return t


def gaussian_diffusion_forward(x, w, bias, *, t=None, eps=None, key=None,
                               tile_bytes=2 << 20, chunk_lanes=2048):
    """Pallas version of GaussianDiffusion.forward / p_losses (loss_type='l1').

    x: (B, C, F, H, W) f32; w: (C, C) / bias: (C,) synthetic denoise_fn params.
    t: (B,) in [0,1) and eps (like x) are sampled from `key` when not given.
    Returns the scalar L1 loss.
    """
    B, C, F_, H, W_ = x.shape
    N = F_ * H * W_

    if t is None or eps is None:
        assert key is not None, "need a PRNG key when t/eps are not provided"
        kt, ke = jax.random.split(key)
        if t is None:
            t = jax.random.uniform(kt, (B,), dtype=jnp.float32)       # torch.rand(b)
        if eps is None:
            eps = jax.random.normal(ke, x.shape, dtype=jnp.float32)   # torch.randn_like(x)

    # Fold a factor of N into the sublane (channel) dim so C*K fills 8 sublanes.
    K = 8 // math.gcd(C, 8)
    if N % K != 0:
        K = 1   # correctness fallback; vreg occupancy degrades when C < 8
    CK = C * K
    NK = N // K
    assert NK % 128 == 0, "f*h*w / K must be a multiple of 128 for lane tiling"

    # Multi-MiB input block per stream; keep >= 2 grid steps for v7x's 2 TensorCores.
    cap_lanes = max(128, tile_bytes // (CK * 4))
    TILE_N = _largest_div_multiple_of_128(NK, cap_lanes)
    if B * (NK // TILE_N) < 2 and NK >= 256:
        TILE_N = _largest_div_multiple_of_128(NK, NK // 2)
    NT = NK // TILE_N
    CHUNK = _largest_div_multiple_of_128(TILE_N, chunk_lanes)

    # Pure row-major reshape: (B, C, N) == (B, C*K, N//K); no data movement.
    x3 = x.reshape(B, CK, NK)
    eps3 = eps.reshape(B, CK, NK)

    # Cosine schedule (get_alpha_cum; intentionally NOT normalized by f(0), per stage1.py).
    alpha_cum = jnp.where(
        t >= 0.0,
        jnp.clip(jnp.cos((t + 0.008) / 1.008 * (math.pi * 0.5)), 0.0, 1.0) ** 2,
        1.0)
    sqrt_ac = jnp.sqrt(alpha_cum).astype(jnp.float32)
    sqrt_om = jnp.sqrt(1.0 - alpha_cum).astype(jnp.float32)

    # Folded (CK, CK) weight / (CK, 1) bias: row r = c*K + k holds channel c, chunk k.
    w32 = jnp.asarray(w, jnp.float32)
    Wf = jnp.kron(w32, jnp.eye(K, dtype=jnp.float32))                 # (CK, CK)
    bias_f = jnp.repeat(jnp.asarray(bias, jnp.float32), K).reshape(CK, 1)

    kernel = functools.partial(_diffusion_l1_kernel, CK=CK, TILE_N=TILE_N, CHUNK=CHUNK)

    part_shape = jax.ShapeDtypeStruct((B, NT, CK, 128), jnp.float32)
    part_spec = pl.BlockSpec((None, None, CK, 128), lambda b, n, *_: (b, n, 0, 0))
    x_spec = pl.BlockSpec((None, CK, TILE_N), lambda b, n, *_: (b, 0, n))
    eps_spec = pl.BlockSpec((None, CK, TILE_N), lambda b, n, *_: (b, 0, n))
    w_spec = pl.BlockSpec((CK, CK), lambda b, n, *_: (0, 0))
    b_spec = pl.BlockSpec((CK, 1), lambda b, n, *_: (0, 0))

    # VMEM budget: 2 streamed blocks x double buffering + weights/partials + headroom.
    per_step = 2 * CK * TILE_N * 4 + CK * 128 * 4 + CK * CK * 4 + CK * 4
    vmem_limit = int(min(40 << 20, max(8 << 20, 3 * per_step)))

    partials = pl.pallas_call(
        kernel,
        out_shape=part_shape,
        grid_spec=pltpu.PrefetchScalarGridSpec(
            num_scalar_prefetch=2,          # sqrt_ac, sqrt_om -> SMEM
            grid=(B, NT),
            in_specs=[x_spec, eps_spec, w_spec, b_spec],
            out_specs=part_spec,
        ),
        compiler_params=pltpu.CompilerParams(
            dimension_semantics=("parallel", "parallel"),
            vmem_limit_bytes=vmem_limit),
    )(sqrt_ac, sqrt_om, x3, eps3, Wf, bias_f)

    # F.l1_loss(x, x_recon, reduction='mean'): mean over all B*C*N elements.
    return jnp.sum(partials) / float(B * C * N)


if __name__ == "__main__":
    # Small shapes consistent with (b, c, f, h, w).
    B, C, F_, H, W_ = 2, 4, 8, 16, 16

    key = jax.random.PRNGKey(0)
    kx, kt, ke, kw, kb = jax.random.split(key, 5)

    x = jax.random.normal(kx, (B, C, F_, H, W_), dtype=jnp.float32)
    t = jax.random.uniform(kt, (B,), dtype=jnp.float32)           # torch.rand(b)
    eps = jax.random.normal(ke, x.shape, dtype=jnp.float32)       # torch.randn_like(x)
    w = jax.random.normal(kw, (C, C), dtype=jnp.float32) * 0.1    # synthetic denoise_fn
    bias = jax.random.normal(kb, (C,), dtype=jnp.float32) * 0.01

    loss = gaussian_diffusion_forward(x, w, bias, t=t, eps=eps)
    loss = jax.block_until_ready(loss)

    # Pure-XLA reference of the same forward pass (same t, same eps).
    ac = jnp.where(t >= 0.0,
                   jnp.clip(jnp.cos((t + 0.008) / 1.008 * (math.pi * 0.5)), 0.0, 1.0) ** 2,
                   1.0)
    sa = jnp.sqrt(ac)[:, None, None, None, None]
    so = jnp.sqrt(1.0 - ac)[:, None, None, None, None]
    z = sa * x + so * eps
    recon = jnp.einsum('oc,bcfhw->bofhw', w, z,
                       precision=lax.Precision.HIGHEST) + bias[None, :, None, None, None]
    ref_loss = jnp.mean(jnp.abs(x - recon))
    assert jnp.allclose(loss, ref_loss, rtol=2e-3, atol=1e-4), (float(loss), float(ref_loss))

    # forward()-style call: t and eps sampled on the fly from a key.
    loss2 = jax.block_until_ready(
        gaussian_diffusion_forward(x, w, bias, key=jax.random.PRNGKey(1)))
    assert bool(jnp.isfinite(loss2))

    print("KERNEL_OK")
</pallas_src>

<mosaic_0001>
module attributes {stable_mosaic.version = 11 : i64} {
  func.func @_diffusion_l1_kernel(%arg0: i32, %arg1: i32, %arg2: memref<2xf32, #tpu.memory_space<smem>>, %arg3: memref<2xf32, #tpu.memory_space<smem>>, %arg4: memref<1x8x1024xf32, #tpu.memory_space<vmem>>, %arg5: memref<1x8x1024xf32, #tpu.memory_space<vmem>>, %arg6: memref<8x8xf32, #tpu.memory_space<vmem>>, %arg7: memref<8x1xf32, #tpu.memory_space<vmem>>, %arg8: memref<1x1x8x128xf32, #tpu.memory_space<vmem>>) attributes {dimension_semantics = [#tpu.dimension_semantics<parallel>, #tpu.dimension_semantics<parallel>], iteration_bounds = array<i64: 2, 1>, scalar_prefetch = 2 : i64, scratch_operands = 0 : i64, tpu.core_type = #tpu.core_type<tc>, window_params = [{transform_indices = @transform_0, window_bounds = array<i64: 1, 8, 1024>}, {transform_indices = @transform_1, window_bounds = array<i64: 1, 8, 1024>}, {pipeline_mode = #tpu.pipeline_mode<synchronous>, transform_indices = @transform_2, window_bounds = array<i64: 8, 8>}, {pipeline_mode = #tpu.pipeline_mode<synchronous>, transform_indices = @transform_3, window_bounds = array<i64: 8, 1>}, {transform_indices = @transform_4, window_bounds = array<i64: 1, 1, 8, 128>}]} {
    %0 = arith.index_cast %arg0 : i32 to index
    %1 = memref.load %arg2[%0] : memref<2xf32, #tpu.memory_space<smem>>
    %2 = arith.index_cast %arg0 : i32 to index
    %3 = memref.load %arg3[%2] : memref<2xf32, #tpu.memory_space<smem>>
    %c0 = arith.constant 0 : index
    %c0_0 = arith.constant 0 : index
    %4 = vector.load %arg6[%c0, %c0_0] : memref<8x8xf32, #tpu.memory_space<vmem>>, vector<8x8xf32>
    %c0_1 = arith.constant 0 : index
    %c0_2 = arith.constant 0 : index
    %5 = vector.load %arg7[%c0_1, %c0_2] : memref<8x1xf32, #tpu.memory_space<vmem>>, vector<8x1xf32>
    %cst = arith.constant 0.000000e+00 : f32
    %6 = vector.broadcast %cst : f32 to vector<8x128xf32>
    %c0_i32 = arith.constant 0 : i32
    %c1024_i32 = arith.constant 1024 : i32
    %7 = arith.muli %c0_i32, %c1024_i32 : i32
    %c0_3 = arith.constant 0 : index
    %c0_4 = arith.constant 0 : index
    %8 = arith.index_cast %7 : i32 to index
    %9 = vector.load %arg4[%c0_3, %c0_4, %8] : memref<1x8x1024xf32, #tpu.memory_space<vmem>>, vector<1x8x1024xf32>
    %10 = vector.shape_cast %9 : vector<1x8x1024xf32> to vector<8x1024xf32>
    %c0_5 = arith.constant 0 : index
    %c0_6 = arith.constant 0 : index
    %11 = arith.index_cast %7 : i32 to index
    %12 = vector.load %arg5[%c0_5, %c0_6, %11] : memref<1x8x1024xf32, #tpu.memory_space<vmem>>, vector<1x8x1024xf32>
    %13 = vector.shape_cast %12 : vector<1x8x1024xf32> to vector<8x1024xf32>
    %14 = vector.broadcast %1 : f32 to vector<8x1024xf32>
    %15 = arith.mulf %14, %10 : vector<8x1024xf32>
    %16 = vector.broadcast %3 : f32 to vector<8x1024xf32>
    %17 = arith.mulf %16, %13 : vector<8x1024xf32>
    %18 = arith.addf %15, %17 : vector<8x1024xf32>
    %cst_7 = arith.constant dense<0.000000e+00> : vector<8x1024xf32>
    %19 = tpu.matmul %4, %18, %cst_7 {dimension_numbers = #tpu.dot_dimension_numbers<[1], [0], [0], [1], [0, 0, 1, 1], [], []>, precision = #tpu.contract_precision<fp32>} : vector<8x8xf32>, vector<8x1024xf32>, vector<8x1024xf32> -> vector<8x1024xf32>
    %20 = vector.broadcast %5 : vector<8x1xf32> to vector<8x1024xf32>
    %21 = arith.addf %19, %20 : vector<8x1024xf32>
    %22 = arith.subf %10, %21 : vector<8x1024xf32>
    %23 = math.absf %22 : vector<8x1024xf32>
    %24 = vector.extract_strided_slice %23 {offsets = [0, 0], sizes = [8, 128], strides = [1, 1]} : vector<8x1024xf32> to vector<8x128xf32>
    %25 = vector.extract_strided_slice %23 {offsets = [0, 128], sizes = [8, 128], strides = [1, 1]} : vector<8x1024xf32> to vector<8x128xf32>
    %26 = arith.addf %24, %25 : vector<8x128xf32>
    %27 = vector.extract_strided_slice %23 {offsets = [0, 256], sizes = [8, 128], strides = [1, 1]} : vector<8x1024xf32> to vector<8x128xf32>
    %28 = arith.addf %26, %27 : vector<8x128xf32>
    %29 = vector.extract_strided_slice %23 {offsets = [0, 384], sizes = [8, 128], strides = [1, 1]} : vector<8x1024xf32> to vector<8x128xf32>
    %30 = arith.addf %28, %29 : vector<8x128xf32>
    %31 = vector.extract_strided_slice %23 {offsets = [0, 512], sizes = [8, 128], strides = [1, 1]} : vector<8x1024xf32> to vector<8x128xf32>
    %32 = arith.addf %30, %31 : vector<8x128xf32>
    %33 = vector.extract_strided_slice %23 {offsets = [0, 640], sizes = [8, 128], strides = [1, 1]} : vector<8x1024xf32> to vector<8x128xf32>
    %34 = arith.addf %32, %33 : vector<8x128xf32>
    %35 = vector.extract_strided_slice %23 {offsets = [0, 768], sizes = [8, 128], strides = [1, 1]} : vector<8x1024xf32> to vector<8x128xf32>
    %36 = arith.addf %34, %35 : vector<8x128xf32>
    %37 = vector.extract_strided_slice %23 {offsets = [0, 896], sizes = [8, 128], strides = [1, 1]} : vector<8x1024xf32> to vector<8x128xf32>
    %38 = arith.addf %36, %37 : vector<8x128xf32>
    %39 = arith.addf %6, %38 : vector<8x128xf32>
    %c1_i32 = arith.constant 1 : i32
    %c0_8 = arith.constant 0 : index
    %c0_9 = arith.constant 0 : index
    %c0_10 = arith.constant 0 : index
    %c0_11 = arith.constant 0 : index
    %40 = vector.load %arg8[%c0_8, %c0_9, %c0_10, %c0_11] : memref<1x1x8x128xf32, #tpu.memory_space<vmem>>, vector<1x1x8x128xf32>
    %41 = vector.shape_cast %40 : vector<1x1x8x128xf32> to vector<8x128xf32>
    %42 = vector.shape_cast %39 : vector<8x128xf32> to vector<1x1x8x128xf32>
    tpu.vector_store %arg8[%c0_8, %c0_9, %c0_10, %c0_11], %42 {strides = array<i32>} : memref<1x1x8x128xf32, #tpu.memory_space<vmem>>, vector<1x1x8x128xf32>,
    return
  }
  func.func @transform_0(%arg0: i32, %arg1: i32, %arg2: memref<2xf32, #tpu.memory_space<smem>>, %arg3: memref<2xf32, #tpu.memory_space<smem>>) -> (i32, i32, i32) {
    %c0_i32 = arith.constant 0 : i32
    %c0_i32_0 = arith.constant 0 : i32
    return %arg0, %c0_i32, %arg1 : i32, i32, i32
  }
  func.func @transform_1(%arg0: i32, %arg1: i32, %arg2: memref<2xf32, #tpu.memory_space<smem>>, %arg3: memref<2xf32, #tpu.memory_space<smem>>) -> (i32, i32, i32) {
    %c0_i32 = arith.constant 0 : i32
    %c0_i32_0 = arith.constant 0 : i32
    return %arg0, %c0_i32, %arg1 : i32, i32, i32
  }
  func.func @transform_2(%arg0: i32, %arg1: i32, %arg2: memref<2xf32, #tpu.memory_space<smem>>, %arg3: memref<2xf32, #tpu.memory_space<smem>>) -> (i32, i32) {
    %c0_i32 = arith.constant 0 : i32
    %c0_i32_0 = arith.constant 0 : i32
    %c0_i32_1 = arith.constant 0 : i32
    return %c0_i32, %c0_i32_0 : i32, i32
  }
  func.func @transform_3(%arg0: i32, %arg1: i32, %arg2: memref<2xf32, #tpu.memory_space<smem>>, %arg3: memref<2xf32, #tpu.memory_space<smem>>) -> (i32, i32) {
    %c0_i32 = arith.constant 0 : i32
    %c0_i32_0 = arith.constant 0 : i32
    %c0_i32_1 = arith.constant 0 : i32
    return %c0_i32, %c0_i32_0 : i32, i32
  }
  func.func @transform_4(%arg0: i32, %arg1: i32, %arg2: memref<2xf32, #tpu.memory_space<smem>>, %arg3: memref<2xf32, #tpu.memory_space<smem>>) -> (i32, i32, i32, i32) {
    %c0_i32 = arith.constant 0 : i32
    %c0_i32_0 = arith.constant 0 : i32
    %c0_i32_1 = arith.constant 0 : i32
    return %arg0, %arg1, %c0_i32, %c0_i32_0 : i32, i32, i32, i32
  }
}

</mosaic_0001>

<bundles_post_ra>
// kernel: tpu_custom_call.1
= control target key start
LH: loop header
LB: loop body
LE: loop exit
PB: predicated region body
PF: predicated region fallthrough
CT: control target
= control target key end

     0   :  { %s3022_s0 = inlined_call_operand.vmem [shape: f32[2], index: 0, kind: input, shape index: {}]   ;;  %s3023_s2 = inlined_call_operand.hbm [shape: f32[2,8,1024], index: 2, kind: input, shape index: {}]   ;;  %s3024_s3 = inlined_call_operand.hbm [shape: f32[2,8,1024], index: 3, kind: input, shape index: {}]   ;;  %s3025_s4 = inlined_call_operand.vmem [shape: f32[8,8], index: 4, kind: input, shape index: {}]   ;;  %s3026_s5 = inlined_call_operand.vmem [shape: f32[8,1], index: 5, kind: input, shape index: {}]   ;;  %s3027_s6 = inlined_call_operand.hbm [shape: f32[2,1,8,128], index: 6, kind: output, shape index: {}]   ;;  %s3028_s1 = inlined_call_operand.vmem [shape: f32[2], index: 1, kind: input, shape index: {}]  }
   0x1   :  { %s11_s23 = sshll.u32 %s3022_s0, 4  ;;  %s15_s26 = sshll.u32 %s3028_s1, 4  ;;  %s12_s23 = int_to_ptr.vmem [resolvable:$true] %s11_s23  ;;  %s16_s26 = int_to_ptr.vmem [resolvable:$true] %s15_s26 }
   0x2   :  { %s2443_s27 = scalar_lea.vmem %s12_s23, 16  ;;  %p2448_p1 = scmp.lt.s32.totalorder %s12_s23, %s12_s23 }
   0x3   :  { %p2444_p0 = scmp.ne.s32.totalorder %s12_s23, %s2443_s27  ;;  %p2449_p2 = scmp.lt.s32.totalorder %s2443_s27, %s2443_s27 }
   0x5   :  { %p2450_p3 = por %p2449_p2, %p2448_p1 }
   0x7   :  { %p2451_p4 = pnand %p2450_p3, %p2444_p0 }
   0x9   :  { %2454 = shalt.err (!%p2451_p4)  }
   0xa   :  { %s2611_s28 = smov [#allocation3]   ;;  %s2455_s29 = scalar_lea.vmem %s16_s26, 16 }
   0xb   :  { %14 = dma.vmem_to_smem %s12_s23, 16, %s2611_s28, [#allocation2] }
   0xc   :  { %p2456_p5 = scmp.ne.s32.totalorder %s16_s26, %s2455_s29  ;;  %p2460_p6 = scmp.lt.s32.totalorder %s16_s26, %s16_s26 }
   0xd   :  { %p2461_p7 = scmp.lt.s32.totalorder %s2455_s29, %s2455_s29 }
   0xf   :  { %p2462_p8 = por %p2461_p7, %p2460_p6 }
  0x11   :  { %p2463_p9 = pnand %p2462_p8, %p2456_p5 }
  0x13   :  { %2466 = shalt.err (!%p2463_p9)  }
  0x14   :  { %s2612_s0 = smov [#allocation4]  }
  0x15   :  { %18 = dma.vmem_to_smem %s16_s26, 16, %s2612_s0, [#allocation2] }
  0x16   :  { %2573 = dma.done.wait [#allocation2], 32 }
  0x17   :  { %2574 = vsyncadd [#allocation2], 4294967264 }
  0x18   :  { %20 = sfence }
  0x19   :  { %21 = vsyncpa [#allocation6], 0 }
  0x1a   :  { %23 = vsyncpa [#allocation6 + $0x1], 0 }
  0x1b   :  { %24 = vsyncpa [#allocation9], 0 }
  0x1c   :  { %26 = vsyncpa [#allocation9 + $0x1], 0 }
  0x1d   :  { %27 = vsyncpa [#allocation7], 0 }
  0x1e   :  { %29 = vsyncpa [#allocation7 + $0x1], 0  ;;  %s2659_s1 = smov 0   ;;  %s2661_s30 = smov 0  }
  0x1f   :  { %s2663_s7 = smov 0   ;;  %s2665_s8 = smov 0  }
  0x20   :  { %s2667_s9 = smov 0   ;;  %s2669_s10 = smov 0  }
  0x21 LB: > { %s2351_s11 = sadd.s32 4294967295, %s2609_s10   ;;  %s2352_s12 = sadd.s32 4294967294, %s2609_s10   ;;  %s2609_s10 = sphi %s2669_s10, %s35_s10   ;;  %s2605_s9 = sphi %s2667_s9, %s3040_s9   ;;  %s2601_s8 = sphi %s2665_s8, %s3039_s8   ;;  %s2597_s7 = sphi %s2663_s7, %s3038_s7   ;;  %s2593_s30 = sphi %s2661_s30, %s3037_s30   ;;  %s2589_s1 = sphi %s2659_s1, %s3036_s1  }
  0x22   : > { %s47_s13 = sadd.s32 1, %s2605_s9  ;;  %s56_s14 = sadd.s32 1, %s2597_s7 }
  0x23   : > { %p49_p10 = scmp.ge.s32.totalorder %s47_s13, 2  ;;  %p63_p11 = scmp.ne.s32.totalorder %s2597_s7, %s2593_s30 }
  0x24   : > { %p64_p12 = scmp.eq.s32.totalorder %s2609_s10, 0  ;;  %p69_p13 = scmp.ne.s32.totalorder %s2593_s30, %s2589_s1 }
  0x25   : > { %s3042_s13 = smov (%p49_p10, %s47_s13), 0  ;;  %p70_p1 = scmp.eq.s32.totalorder %s2351_s11, 0 }
  0x26   : > { %p2700_p0 = por %p64_p12, %p63_p11  ;;  %s51_s16 = ssub.s32 %s2605_s9, %s3042_s13 }
  0x27   : > { %p165_p2 = scmp.eq.s32.totalorder %s2351_s11, 1  ;;  %p54_p3 = scmp.eq.s32.totalorder %s51_s16, 0 }
  0x28   : > { %p2706_p4 = por %p70_p1, %p69_p13  ;;  %p171_p6 = scmp.eq.s32.totalorder %s2352_s12, 1 }
  0x29   : > { %p2710_p5 = por %p165_p2, %p63_p11  ;;  %p2388_p9 = scmp.lt.s32.totalorder %s2609_s10, 2 }
  0x2a   : > { %s2715_s19 = scalar_select %p54_p3, %s2597_s7, %s56_s14  }
  0x2b   : > { %p2717_p7 = por %p171_p6, %p69_p13  ;;  %s2724_s21 = sand.u32 1, %s2597_s7  }
  0x2c   : > { %s2355_s22 = sshll.u32 %s2724_s21, 6  ;;  %s2369_s23 = sshll.u32 %s2605_s9, 10 }
  0x2d   : > { %s209_s26 = scalar_lea.hbm %s3023_s2, %s2369_s23  ;;  %s201_s27 = scalar_lea.vmem [#allocation5], %s2355_s22 }
  0x2e   : > { %s211_s28 = sshll.u32 %s201_s27, 4  ;;  %p2733_p10 = pnand %p2388_p9, %p2700_p0  ;;  %s212_s28 = int_to_ptr.vmem [resolvable:$true] %s211_s28 }
  0x2f   : > { %p2361_p11 = scmp.ge.s32.totalorder %s2609_s10, 1  ;;  %p237_p12 = scmp.lt.s32.totalorder %s2609_s10, 3 }
  0x30   : > { %s198_s0 = scalar_lea.sflag [#allocation6], %s2724_s21  ;;  %p2469_p13 = pneg %p2733_p10 }
  0x31   : > { %s2480_s11 = scalar_lea.vmem %s212_s28, 1024  ;;  %s2613_s12 = smov [#allocation5]  }
  0x32   : > { %p2481_p1 = scmp.ne.s32.totalorder %s212_s28, %s2480_s11  ;;  %s2485_s14 = sshll.u32 %s2613_s12, 4  ;;  %s2486_s14 = int_to_ptr.vmem [resolvable:$false] %s2485_s14 }
  0x33   : > { %s2487_s15 = scalar_lea.vmem %s2486_s14, 2048  ;;  %p2488_p0 = scmp.lt.s32.totalorder %s212_s28, %s2486_s14 }
  0x34   : > { %p2483_p2 = pnand %p2481_p1, %p2469_p13  ;;  %p2489_p6 = scmp.lt.s32.totalorder %s2487_s15, %s2480_s11 }
  0x36   : > { %p2484_p3 = pneg %p2483_p2  ;;  %p2490_p9 = por %p2489_p6, %p2488_p0 }
  0x38   : > { %p2491_p8 = pnand %p2490_p9, %p2484_p3 }
  0x3a   : > { %2494 = shalt.err (!%p2491_p8)
}
  0x3b   : > { %2380 = dma.hbm_to_vmem [thread:$0]  (!%p2733_p10), %s209_s26, 1024, %s212_s28, %s198_s0  }
  0x3c   : > { %p2751_p1 = pnand %p2361_p11, %p237_p12  ;;  %s230_s27 = scalar_lea.hbm %s3024_s3, %s2369_s23 }
  0x3d   : > { %s222_s11 = scalar_lea.vmem [#allocation8], %s2355_s22  ;;  %s219_s14 = scalar_lea.sflag [#allocation9], %s2724_s21 }
  0x3e   : > { %s232_s12 = sshll.u32 %s222_s11, 4  ;;  %s2614_s26 = smov [#allocation8]   ;;  %s233_s12 = int_to_ptr.vmem [resolvable:$true] %s232_s12 }
  0x3f   : > { %s2508_s15 = scalar_lea.vmem %s233_s12, 1024  ;;  %s2513_s28 = sshll.u32 %s2614_s26, 4  ;;  %s2514_s28 = int_to_ptr.vmem [resolvable:$false] %s2513_s28 }
  0x40   : > { %p2509_p8 = scmp.ne.s32.totalorder %s233_s12, %s2508_s15  ;;  %s2515_s0 = scalar_lea.vmem %s2514_s28, 2048 }
  0x41   : > { %p2516_p11 = scmp.lt.s32.totalorder %s233_s12, %s2514_s28  ;;  %p2517_p12 = scmp.lt.s32.totalorder %s2515_s0, %s2508_s15 }
  0x42   : > { %p2511_p2 = pnand %p2509_p8, %p2469_p13 }
  0x43   : > { %p2518_p0 = por %p2517_p12, %p2516_p11 }
  0x44   : > { %p2512_p3 = pneg %p2511_p2 }
  0x46   : > { %p2519_p6 = pnand %p2518_p0, %p2512_p3 }
  0x48   : > { %2522 = shalt.err (!%p2519_p6)
}
  0x49   : > { %2383 = dma.hbm_to_vmem [thread:$0]  (!%p2733_p10), %s230_s27, 1024, %s233_s12, %s219_s14  }
  0x4a   : > { %241 = sbr.rel (%p2751_p1) target bundleno = 366 (0x16e), region = 36  ;;  %s2767_s21 = sand.u32 (!%p2751_p1), 1, %s2593_s30  }
  0x4b   : > { %s2362_s22 = sshll.u32 (!%p2751_p1), %s2767_s21, 6  ;;  %s244_s23 = scalar_lea.sflag (!%p2751_p1), [#allocation6], %s2767_s21 }
  0x4c   : > { %s2771_s24 = scalar_lea.vmem (!%p2751_p1), [#allocation5], %s2362_s22 }
  0x4f   : > { %2576 = dma.done.wait (%p2706_p4), %s244_s23, 1024  }
  0x50   : > { %2578 = vsyncadd (%p2706_p4), %s244_s23, 4294966272  ;;  %s253_s29 = scalar_lea.sflag [#allocation9], %s2767_s21  ;;  %s2778_s16 = scalar_lea.vmem [#allocation8], %s2362_s22 }
  0x51   : > { %2580 = dma.done.wait (%p2706_p4), %s253_s29, 1024  }
  0x52   : > { %2582 = vsyncadd (%p2706_p4), %s253_s29, 4294966272  ;;  %s288_s25 = sld [smem:[#allocation3 + %s2601_s8]]  ;;  %v2615_v0 = vmov 0.0   ;;  %v2616_v1 = vmov 0   ;;  %vm339_vm0 = vcmask 64512   ;;  %v2789_v2 = vld [vmem:[%s2771_s24 + $0x8] sm:$0xff] }
  0x53   : > { %409 = vmatprep.mubr.f32.mxu0 %v2615_v0  ;;  %495 = vmatprep.mubr.f32.mxu1 %v2615_v0  ;;  %s289_s27 = sld [smem:[#allocation4 + %s2601_s8]]  ;;  %v301_v3 = vld [vmem:[%s2778_s16 + $0x8] sm:$0xff]  ;;  %v2795_v5 = vld [vmem:[%s2771_s24] sm:$0xff]  ;;  %v2808_v11 = vld [vmem:[%s2771_s24 + $0x18] sm:$0xff]  ;;  %s2364_s15 = sshll.u32 %s2767_s21, 3 }
  0x54   : > { %2442 = vset.pattern.permute.xlu0 %v2616_v1  ;;  %v300_v8 = vld [vmem:[%s2778_s16] sm:$0xff]  ;;  %v303_v15 = vld [vmem:[%s2778_s16 + $0x18] sm:$0xff]  ;;  %v2816_v17 = vld [vmem:[%s2771_s24 + $0x10] sm:$0xff]  ;;  %s2366_s26 = sshll.u32 %s2601_s8, 7  ;;  %s285_s28 = scalar_lea.vmem [#allocation10], %s2364_s15 }
  0x55   : > { %v290_v10 = vld [vmem:[%s3025_s4] sm:$0xff]  ;;  %v302_v18 = vld [vmem:[%s2778_s16 + $0x10] sm:$0xff]  ;;  %v2832_v31 = vld [vmem:[%s2771_s24 + $0x28] sm:$0xff]  ;;  %s2243_s0 = sshll.u32 %s285_s28, 4  ;;  %s2229_s29 = scalar_lea.sflag [#allocation7], %s2767_s21  ;;  %s2244_s0 = int_to_ptr.vmem [resolvable:$true] %s2243_s0 }
  0x56   : > { %v341_v14 = vsel %vm339_vm0, %v290_v10, 0  ;;  %v291_v28 = vld [vmem:[%s3026_s5] sm:$0xff]  ;;  %v305_v32 = vld [vmem:[%s2778_s16 + $0x28] sm:$0xff]  ;;  %v2872_v60 = vld [vmem:[%s2771_s24 + $0x38] sm:$0xff] }
  0x57   : > { %v2819_v19 = vand.u32 4294901760, %v341_v14  ;;  %336 = vperm.xlu0 %2442, %v291_v28   ;;  %v2843_v38 = vld [vmem:[%s2771_s24 + $0x20] sm:$0xff]  ;;  %v307_v61 = vld [vmem:[%s2778_s16 + $0x38] sm:$0xff]  ;;  %v2881_v1 = vld [vmem:[%s2771_s24 + $0x30] sm:$0xff]  ;;  %s2241_s24 = scalar_lea.hbm %s3027_s6, %s2366_s26 }
  0x58   : > { %v2792_v4 = vstv %s288_s25  ;;  %v304_v39 = vld [vmem:[%s2778_s16 + $0x20] sm:$0xff]  ;;  %s2617_s25 = smov [#allocation10]  }
  0x59   : > { %v310_v6 = vmul.f32 %v2792_v4, %v2789_v2  ;;  %v2799_v7 = vstv %s289_s27  ;;  %v309_v9 = vmul.f32 %v2792_v4, %v2795_v5  ;;  %v312_v16 = vmul.f32 %v2792_v4, %v2808_v11  ;;  %s2527_s27 = sshll.u32 %s2617_s25, 4  ;;  %s2528_s27 = int_to_ptr.vmem [resolvable:$false] %s2527_s27 }
  0x5a   : > { %v319_v12 = vmul.f32 %v2799_v7, %v301_v3  ;;  %v318_v13 = vmul.f32 %v2799_v7, %v300_v8  ;;  %v321_v20 = vmul.f32 %v2799_v7, %v303_v15  ;;  %v311_v21 = vmul.f32 %v2792_v4, %v2816_v17  ;;  %v306_v3 = vld [vmem:[%s2778_s16 + $0x30] sm:$0xff]  ;;  %s2523_s16 = scalar_lea.vmem %s2244_s0, 128  ;;  %s2529_s8 = scalar_lea.vmem %s2528_s27, 256 }
  0x5b   : > { %v320_v22 = vmul.f32 %v2799_v7, %v302_v18  ;;  %v2826_v25 = vsub.f32 %v341_v14, %v2819_v19  ;;  %v314_v42 = vmul.f32 %v2792_v4, %v2832_v31  ;;  %v323_v43 = vmul.f32 %v2799_v7, %v305_v32  ;;  %p2524_p4 = scmp.ne.s32.totalorder %s2244_s0, %s2523_s16  ;;  %p2530_p9 = scmp.lt.s32.totalorder %s2244_s0, %s2528_s27 }
  0x5c   : > { %v327_v23 = vadd.f32 %v319_v12, %v310_v6  ;;  %v326_v24 = vadd.f32 %v318_v13, %v309_v9  ;;  %v329_v26 = vadd.f32 %v321_v20, %v312_v16  ;;  %v313_v48 = vmul.f32 %v2792_v4, %v2843_v38  ;;  %p2531_p1 = scmp.lt.s32.totalorder %s2529_s8, %s2523_s16 }
  0x5d   : > { %v328_v27 = vadd.f32 %v320_v22, %v311_v21  ;;  %v2836_v33 = vand.u32 4294901760, %v2826_v25  ;;  %v322_v49 = vmul.f32 %v2799_v7, %v304_v39  ;;  %v331_v53 = vadd.f32 %v323_v43, %v314_v42  ;;  %p2525_p10 = pnand %p2524_p4, %p2710_p5 }
  0x5e   : > { %v373_v29 = vand.u32 4294901760, %v327_v23  ;;  %v375_v30 = vand.u32 4294901760, %v326_v24  ;;  %v2838_v34 = vand.u32 4294901760, %v329_v26  ;;  %v316_v9 = vmul.f32 %v2792_v4, %v2872_v60  ;;  %p2532_p8 = por %p2531_p1, %p2530_p9 }
  0x5f   : > { %v2840_v35 = vand.u32 4294901760, %v328_v27  ;;  %v413_v40 = vsub.f32 %v2826_v25, %v2836_v33  ;;  %v330_v57 = vadd.f32 %v322_v49, %v313_v48  ;;  %v2868_v59 = vand.u32 4294901760, %v331_v53  ;;  %p2526_p13 = pneg %p2525_p10 }
  0x60   : > { %374 = vmatprep.subr.mxu0 %v373_v29  ;;  %v452_v36 = vsub.f32 %v327_v23, %v373_v29  ;;  %v458_v37 = vsub.f32 %v326_v24, %v375_v30  ;;  %v2849_v41 = vsub.f32 %v329_v26, %v2838_v34  ;;  %v325_v10 = vmul.f32 %v2799_v7, %v307_v61 }
  0x61   : > { %376 = vmatpush1.msra.mxu0 %v375_v30  ;;  %v2854_v46 = vand.u32 4294901760, %v413_v40  ;;  %v2857_v47 = vsub.f32 %v328_v27, %v2840_v35  ;;  %v2876_v63 = vand.u32 4294901760, %v330_v57  ;;  %v2886_v8 = vsub.f32 %v331_v53, %v2868_v59  ;;  %p2533_p2 = pnand %p2532_p8, %p2526_p13 }
  0x62   : > { %535 = vmatprep.subr.mxu0 %v452_v36  ;;  %v453_v44 = vand.u32 4294901760, %v452_v36  ;;  %v459_v45 = vand.u32 4294901760, %v458_v37  ;;  %v918_v52 = vand.u32 4294901760, %v2849_v41  ;;  %v315_v14 = vmul.f32 %v2792_v4, %v2881_v1 }
  0x63   : > { %415 = vmatmul.mubr.f32.vlgmr.msra.gmra.mxu0 %v2854_v46  ;;  %v924_v56 = vand.u32 4294901760, %v2857_v47  ;;  %v1388_v13 = vsub.f32 %v330_v57, %v2876_v63  ;;  %v324_v15 = vmul.f32 %v2799_v7, %v306_v3  ;;  %v1383_v16 = vand.u32 4294901760, %v2886_v8 }
  0x64   : > { %v454_v50 = vsub.f32 %v452_v36, %v453_v44  ;;  %v460_v51 = vsub.f32 %v458_v37, %v459_v45  ;;  %538 = vmatpush1.msra.mxu0 %v458_v37  ;;  %571 = vmatprep.mubr.f32.mxu0 %v2615_v0  ;;  %v919_v58 = vsub.f32 %v2849_v41, %v918_v52 }
  0x65   : > { %689 = vmatprep.subr.mxu0 %v453_v44  ;;  %v925_v62 = vsub.f32 %v2857_v47, %v924_v56  ;;  %v333_v18 = vadd.f32 %v325_v10, %v316_v9  ;;  %v1389_v4 = vand.u32 4294901760, %v1388_v13  ;;  %v332_v20 = vadd.f32 %v324_v15, %v315_v14 }
  0x66   : > { %v455_v54 = vand.u32 4294901760, %v454_v50  ;;  %v461_v55 = vand.u32 4294901760, %v460_v51  ;;  %v920_v6 = vand.u32 4294901760, %v919_v58  ;;  %v1384_v7 = vsub.f32 %v2886_v8, %v1383_v16 }
  0x67   : > { %574 = vmatmul.mubr.f32.vlgmr.msra.gmra.mxu0 %v2826_v25  ;;  %v926_v12 = vand.u32 4294901760, %v925_v62  ;;  %v2910_v21 = vand.u32 4294901760, %v333_v18  ;;  %v1390_v22 = vsub.f32 %v1388_v13, %v1389_v4  ;;  %v2914_v23 = vand.u32 4294901760, %v332_v20 }
  0x68   : > { %456 = vmatprep.subr.mxu1 %v455_v54  ;;  %693 = vmatpush1.msra.mxu0 %v459_v45  ;;  %v1385_v24 = vand.u32 4294901760, %v1384_v7 }
  0x69   : > { %462 = vmatpush1.msra.mxu1 %v461_v55  ;;  %726 = vmatprep.mubr.f32.mxu0 %v2615_v0  ;;  %v1847_v26 = vsub.f32 %v333_v18, %v2910_v21  ;;  %v1391_v27 = vand.u32 4294901760, %v1390_v22  ;;  %v1853_v28 = vsub.f32 %v332_v20, %v2914_v23 }
  0x6a   : > { %497 = vmatmul.mubr.f32.vlgmr.msra.gmra.mxu1 %v2819_v19  ;;  %611 = vmatprep.subr.mxu1 %v373_v29 }
  0x6b   : > { %613 = vmatpush1.msra.mxu1 %v375_v30  ;;  %646 = vmatprep.mubr.f32.mxu1 %v2615_v0 }
  0x6c   : > { %728 = vmatmul.mubr.f32.vlgmr.msra.gmra.mxu0 %v2819_v19  ;;  %765 = vmatprep.subr.mxu1 %v373_v29  ;;  %v1848_v29 = vand.u32 4294901760, %v1847_v26 }
  0x6d   : > { %839 = vmatprep.subr.mxu0 %v2838_v34  ;;  %874 = vmatprep.mubr.f32.mxu0 %v2615_v0 }
  0x6e   : > { %650 = vmatmul.mubr.f32.vlgmr.msra.gmra.mxu1 %v2836_v33  ;;  %841 = vmatpush1.msra.mxu0 %v2840_v35  ;;  %v1849_v32 = vsub.f32 %v1847_v26, %v1848_v29 }
  0x6f   : > { %767 = vmatpush1.msra.mxu1 %v375_v30  ;;  %800 = vmatprep.mubr.f32.mxu1 %v2615_v0  ;;  %v1854_v30 = vand.u32 4294901760, %v1853_v28 }
  0x70   : > { %880 = vmatmul.mubr.f32.vlgmr.msra.gmra.mxu0 %v2854_v46  ;;  %921 = vmatprep.subr.mxu1 %v920_v6 }
  0x71   : > { %1000 = vmatprep.subr.mxu0 %v2849_v41  ;;  %1036 = vmatprep.mubr.f32.mxu0 %v2615_v0 }
  0x72   : > { %802 = vmatmul.mubr.f32.vlgmr.msra.gmra.mxu1 %v2819_v19  ;;  %1003 = vmatpush1.msra.mxu0 %v2857_v47 }
  0x73   : > { %927 = vmatpush1.msra.mxu1 %v926_v12  ;;  %960 = vmatprep.mubr.f32.mxu1 %v2615_v0 }
  0x74   : > { %1039 = vmatmul.mubr.f32.vlgmr.msra.gmra.mxu0 %v2826_v25  ;;  %1076 = vmatprep.subr.mxu1 %v2838_v34 }
  0x75   : > { %1154 = vmatprep.subr.mxu0 %v918_v52  ;;  %1191 = vmatprep.mubr.f32.mxu0 %v2615_v0 }
  0x76   : > { %962 = vmatmul.mubr.f32.vlgmr.msra.gmra.mxu1 %v2819_v19  ;;  %1158 = vmatpush1.msra.mxu0 %v924_v56 }
  0x77   : > { %1078 = vmatpush1.msra.mxu1 %v2840_v35  ;;  %1111 = vmatprep.mubr.f32.mxu1 %v2615_v0 }
  0x78   : > { %1193 = vmatmul.mubr.f32.vlgmr.msra.gmra.mxu0 %v2819_v19  ;;  %1230 = vmatprep.subr.mxu1 %v2838_v34  ;;  %v1855_v34 = vsub.f32 %v1853_v28, %v1854_v30 }
  0x79   : > { %1304 = vmatprep.subr.mxu0 %v2868_v59  ;;  %1339 = vmatprep.mubr.f32.mxu0 %v2615_v0 }
  0x7a   : > { %1115 = vmatmul.mubr.f32.vlgmr.msra.gmra.mxu1 %v2836_v33  ;;  %1306 = vmatpush1.msra.mxu0 %v2876_v63  ;;  %v1856_v36 = vand.u32 4294901760, %v1855_v34 }
  0x7b   : > { %1232 = vmatpush1.msra.mxu1 %v2840_v35  ;;  %1265 = vmatprep.mubr.f32.mxu1 %v2615_v0  ;;  %v1850_v35 = vand.u32 4294901760, %v1849_v32 }
  0x7c   : > { %1345 = vmatmul.mubr.f32.vlgmr.msra.gmra.mxu0 %v2854_v46  ;;  %1386 = vmatprep.subr.mxu1 %v1385_v24 }
  0x7d   : > { %1465 = vmatprep.subr.mxu0 %v2886_v8  ;;  %1501 = vmatprep.mubr.f32.mxu0 %v2615_v0 }
  0x7e   : > { %1267 = vmatmul.mubr.f32.vlgmr.msra.gmra.mxu1 %v2819_v19  ;;  %1468 = vmatpush1.msra.mxu0 %v1388_v13 }
  0x7f   : > { %1392 = vmatpush1.msra.mxu1 %v1391_v27  ;;  %1425 = vmatprep.mubr.f32.mxu1 %v2615_v0 }
  0x80   : > { %1504 = vmatmul.mubr.f32.vlgmr.msra.gmra.mxu0 %v2826_v25  ;;  %1541 = vmatprep.subr.mxu1 %v2868_v59 }
  0x81   : > { %1619 = vmatprep.subr.mxu0 %v1383_v16  ;;  %1656 = vmatprep.mubr.f32.mxu0 %v2615_v0 }
  0x82   : > { %1427 = vmatmul.mubr.f32.vlgmr.msra.gmra.mxu1 %v2819_v19  ;;  %1623 = vmatpush1.msra.mxu0 %v1389_v4 }
  0x83   : > { %1543 = vmatpush1.msra.mxu1 %v2876_v63  ;;  %1576 = vmatprep.mubr.f32.mxu1 %v2615_v0 }
  0x84   : > { %1658 = vmatmul.mubr.f32.vlgmr.msra.gmra.mxu0 %v2819_v19  ;;  %1695 = vmatprep.subr.mxu1 %v2868_v59 }
  0x85   : > { %1769 = vmatprep.subr.mxu0 %v2910_v21  ;;  %1804 = vmatprep.mubr.f32.mxu0 %v2615_v0 }
  0x86   : > { %1580 = vmatmul.mubr.f32.vlgmr.msra.gmra.mxu1 %v2836_v33  ;;  %1771 = vmatpush1.msra.mxu0 %v2914_v23 }
  0x87   : > { %1697 = vmatpush1.msra.mxu1 %v2876_v63  ;;  %1730 = vmatprep.mubr.f32.mxu1 %v2615_v0 }
  0x88   : > { %1810 = vmatmul.mubr.f32.vlgmr.msra.gmra.mxu0 %v2854_v46  ;;  %1851 = vmatprep.subr.mxu1 %v1850_v35 }
  0x89   : > { %1930 = vmatprep.subr.mxu0 %v1847_v26  ;;  %1966 = vmatprep.mubr.f32.mxu0 %v2615_v0 }
  0x8a   : > { %1732 = vmatmul.mubr.f32.vlgmr.msra.gmra.mxu1 %v2819_v19  ;;  %1933 = vmatpush1.msra.mxu0 %v1853_v28 }
  0x8b   : > { %1857 = vmatpush1.msra.mxu1 %v1856_v36  ;;  %1890 = vmatprep.mubr.f32.mxu1 %v2615_v0 }
  0x8c   : > { %2006 = vmatprep.subr.mxu1 %v2910_v21  ;;  %1969 = vmatmul.mubr.f32.vlgmr.msra.gmra.mxu0 %v2826_v25 }
  0x8d   : > { %2084 = vmatprep.subr.mxu0 %v1848_v29  ;;  %2121 = vmatprep.mubr.f32.mxu0 %v2615_v0 }
  0x8e   : > { %1892 = vmatmul.mubr.f32.vlgmr.msra.gmra.mxu1 %v2819_v19  ;;  %2088 = vmatpush1.msra.mxu0 %v1854_v30 }
  0x8f   : > { %2008 = vmatpush1.msra.mxu1 %v2914_v23  ;;  %2041 = vmatprep.mubr.f32.mxu1 %v2615_v0 }
  0x90   : > { %2160 = vmatprep.subr.mxu1 %v2910_v21  ;;  %2123 = vmatmul.mubr.f32.vlgmr.msra.gmra.mxu0 %v2819_v19 }
  0x92   : > { %2045 = vmatmul.mubr.f32.vlgmr.msra.gmra.mxu1 %v2836_v33 }
  0x93   : > { %2162 = vmatpush1.msra.mxu1 %v2914_v23  ;;  %2195 = vmatprep.mubr.f32.mxu1 %v2615_v0 }
  0x96   : > { %2197 = vmatmul.mubr.f32.vlgmr.msra.gmra.mxu1 %v2819_v19 }
  0xd2   : > { %v2963_v43 = vpop.permute.xlu0 %336 }
 0x123   : > { %v416_v25 = vpop.f32.mrf.mxu0 }
 0x124   : > { %v417_v47 = vadd.f32 %v416_v25, %v2963_v43 }
 0x125   : > { %v418_v37 = vpop.f32.mrf.mxu0 }
 0x126   : > { %v419_v33 = vadd.f32 %v418_v37, %v2963_v43 }
 0x127   : > { %v575_v39 = vpop.f32.mrf.mxu0 }
 0x129   : > { %v577_v41 = vpop.f32.mrf.mxu0 }
 0x12a   : > { %v498_v40 = vpop.f32.mrf.mxu1 }
 0x12b   : > { %v499_v52 = vadd.f32 %v498_v40, %v417_v47 }
 0x12c   : > { %v500_v42 = vpop.f32.mrf.mxu1  ;;  %v729_v44 = vpop.f32.mrf.mxu0 }
 0x12d   : > { %v501_v0 = vadd.f32 %v500_v42, %v419_v33  ;;  %v576_v61 = vadd.f32 %v575_v39, %v499_v52 }
 0x12e   : > { %v651_v45 = vpop.f32.mrf.mxu1  ;;  %v731_v46 = vpop.f32.mrf.mxu0 }
 0x12f   : > { %v578_v55 = vadd.f32 %v577_v41, %v501_v0  ;;  %v652_v12 = vadd.f32 %v651_v45, %v576_v61 }
 0x130   : > { %v653_v48 = vpop.f32.mrf.mxu1  ;;  %v881_v49 = vpop.f32.mrf.mxu0 }
 0x131   : > { %v882_v19 = vadd.f32 %v881_v49, %v2963_v43  ;;  %v654_v8 = vadd.f32 %v653_v48, %v578_v55  ;;  %v730_v21 = vadd.f32 %v729_v44, %v652_v12 }
 0x132   : > { %v803_v50 = vpop.f32.mrf.mxu1  ;;  %v883_v51 = vpop.f32.mrf.mxu0 }
 0x133   : > { %v884_v57 = vadd.f32 %v883_v51, %v2963_v43  ;;  %v732_v18 = vadd.f32 %v731_v46, %v654_v8  ;;  %v804_v34 = vadd.f32 %v803_v50, %v730_v21 }
 0x134   : > { %v805_v53 = vpop.f32.mrf.mxu1  ;;  %v1040_v54 = vpop.f32.mrf.mxu0 }
 0x135   : > { %v806_v27 = vadd.f32 %v805_v53, %v732_v18  ;;  %v2203_v47 = vsub.f32 %v2795_v5, %v804_v34 }
 0x136   : > { %v963_v56 = vpop.f32.mrf.mxu1  ;;  %v1042_v59 = vpop.f32.mrf.mxu0 }
 0x137   : > { %v964_v58 = vadd.f32 %v963_v56, %v882_v19  ;;  %v2204_v41 = vsub.f32 %v2789_v2, %v806_v27  ;;  %v2211_v56 = vand.u32 2147483647, %v2203_v47 }
 0x138   : > { %v965_v62 = vpop.f32.mrf.mxu1  ;;  %v1194_v3 = vpop.f32.mrf.mxu0 }
 0x139   : > { %v966_v63 = vadd.f32 %v965_v62, %v884_v57  ;;  %v1041_v6 = vadd.f32 %v1040_v54, %v964_v58  ;;  %v2212_v51 = vand.u32 2147483647, %v2204_v41 }
 0x13a   : > { %v1116_v9 = vpop.f32.mrf.mxu1  ;;  %v1196_v10 = vpop.f32.mrf.mxu0 }
 0x13b   : > { %v1117_v14 = vadd.f32 %v1116_v9, %v1041_v6  ;;  %v1043_v15 = vadd.f32 %v1042_v59, %v966_v63  ;;  %v2219_v61 = vadd.f32 %v2212_v51, %v2211_v56 }
 0x13c   : > { %v1118_v13 = vpop.f32.mrf.mxu1  ;;  %v1346_v16 = vpop.f32.mrf.mxu0 }
 0x13d   : > { %v1347_v20 = vadd.f32 %v1346_v16, %v2963_v43  ;;  %v1119_v23 = vadd.f32 %v1118_v13, %v1043_v15  ;;  %v1195_v24 = vadd.f32 %v1194_v3, %v1117_v14 }
 0x13e   : > { %v1268_v4 = vpop.f32.mrf.mxu1  ;;  %v1348_v7 = vpop.f32.mrf.mxu0 }
 0x13f   : > { %v1349_v29 = vadd.f32 %v1348_v7, %v2963_v43  ;;  %v1269_v36 = vadd.f32 %v1268_v4, %v1195_v24  ;;  %v1197_v25 = vadd.f32 %v1196_v10, %v1119_v23 }
 0x140   : > { %v1270_v22 = vpop.f32.mrf.mxu1  ;;  %v1505_v26 = vpop.f32.mrf.mxu0 }
 0x141   : > { %v2205_v48 = vsub.f32 %v2816_v17, %v1269_v36  ;;  %v1271_v49 = vadd.f32 %v1270_v22, %v1197_v25 }
 0x142   : > { %v1428_v28 = vpop.f32.mrf.mxu1  ;;  %v1507_v32 = vpop.f32.mrf.mxu0 }
 0x143   : > { %v1429_v30 = vadd.f32 %v1428_v28, %v1347_v20  ;;  %v2213_v57 = vand.u32 2147483647, %v2205_v48  ;;  %v2206_v58 = vsub.f32 %v2808_v11, %v1271_v49 }
 0x144   : > { %v1430_v35 = vpop.f32.mrf.mxu1  ;;  %v1659_v39 = vpop.f32.mrf.mxu0 }
 0x145   : > { %v1431_v37 = vadd.f32 %v1430_v35, %v1349_v29  ;;  %v1506_v40 = vadd.f32 %v1505_v26, %v1429_v30  ;;  %v2220_v10 = vadd.f32 %v2219_v61, %v2213_v57  ;;  %v2214_v12 = vand.u32 2147483647, %v2206_v58 }
 0x146   : > { %v1581_v42 = vpop.f32.mrf.mxu1  ;;  %v1661_v45 = vpop.f32.mrf.mxu0 }
 0x147   : > { %v1582_v44 = vadd.f32 %v1581_v42, %v1506_v40  ;;  %v1508_v46 = vadd.f32 %v1507_v32, %v1431_v37 }
 0x148   : > { %v1583_v33 = vpop.f32.mrf.mxu1  ;;  %v1811_v50 = vpop.f32.mrf.mxu0 }
 0x149   : > { %v1584_v0 = vadd.f32 %v1583_v33, %v1508_v46  ;;  %v1660_v19 = vadd.f32 %v1659_v39, %v1582_v44  ;;  %v1812_v59 = vadd.f32 %v1811_v50, %v2963_v43 }
 0x14a   : > { %v1733_v52 = vpop.f32.mrf.mxu1  ;;  %v1813_v54 = vpop.f32.mrf.mxu0 }
 0x14b   : > { %v1734_v53 = vadd.f32 %v1733_v52, %v1660_v19  ;;  %v1662_v55 = vadd.f32 %v1661_v45, %v1584_v0  ;;  %v1814_v63 = vadd.f32 %v1813_v54, %v2963_v43 }
 0x14c   : > { %v1735_v2 = vpop.f32.mrf.mxu1  ;;  %v1970_v5 = vpop.f32.mrf.mxu0 }
 0x14d   : > { %v2207_v17 = vsub.f32 %v2843_v38, %v1734_v53  ;;  %v1736_v3 = vadd.f32 %v1735_v2, %v1662_v55  ;;  %v2221_v38 = vadd.f32 %v2220_v10, %v2214_v12 }
 0x14e   : > { %v1893_v62 = vpop.f32.mrf.mxu1  ;;  %v1972_v8 = vpop.f32.mrf.mxu0 }
 0x14f   : > { %v1894_v6 = vadd.f32 %v1893_v62, %v1812_v59  ;;  %v2215_v16 = vand.u32 2147483647, %v2207_v17  ;;  %v2208_v18 = vsub.f32 %v2832_v31, %v1736_v3 }
 0x150   : > { %v1895_v9 = vpop.f32.mrf.mxu1  ;;  %v2124_v11 = vpop.f32.mrf.mxu0 }
 0x151   : > { %v1971_v13 = vadd.f32 %v1970_v5, %v1894_v6  ;;  %v1896_v14 = vadd.f32 %v1895_v9, %v1814_v63  ;;  %v2222_v24 = vadd.f32 %v2221_v38, %v2215_v16  ;;  %v2216_v26 = vand.u32 2147483647, %v2208_v18 }
 0x152   : > { %v2046_v15 = vpop.f32.mrf.mxu1  ;;  %v2126_v22 = vpop.f32.mrf.mxu0 }
 0x153   : > { %v1973_v4 = vadd.f32 %v1972_v8, %v1896_v14  ;;  %v2047_v20 = vadd.f32 %v2046_v15, %v1971_v13  ;;  %v2223_v31 = vadd.f32 %v2222_v24, %v2216_v26 }
 0x154   : > { %v2048_v7 = vpop.f32.mrf.mxu1 }
 0x155   : > { %v2125_v43 = vadd.f32 %v2124_v11, %v2047_v20  ;;  %v2049_v21 = vadd.f32 %v2048_v7, %v1973_v4 }
 0x156   : > { %v2198_v23 = vpop.f32.mrf.mxu1 }
 0x157   : > { %v2127_v27 = vadd.f32 %v2126_v22, %v2049_v21  ;;  %v2199_v28 = vadd.f32 %v2198_v23, %v2125_v43 }
 0x158   : > { %v2200_v29 = vpop.f32.mrf.mxu1 }
 0x159   : > { %v2209_v30 = vsub.f32 %v2881_v1, %v2199_v28  ;;  %v2201_v32 = vadd.f32 %v2200_v29, %v2127_v27 }
 0x15b   : > { %v2217_v34 = vand.u32 2147483647, %v2209_v30  ;;  %v2210_v35 = vsub.f32 %v2872_v60, %v2201_v32 }
 0x15d   : > { %v2224_v36 = vadd.f32 %v2223_v31, %v2217_v34  ;;  %v2218_v25 = vand.u32 2147483647, %v2210_v35 }
 0x15f   : > { %v2225_v37 = vadd.f32 %v2224_v36, %v2218_v25 }
 0x161   : > { %2227 = vst [vmem:[%s285_s28] sm:$0xff] %v2225_v37 }
 0x162   : > { %2536 = shalt.err (!%p2533_p2)
}
 0x163   : > { %s2537_s17 = scalar_lea.hbm %s2241_s24, 128  ;;  %s2541_s12 = scalar_lea.hbm %s3027_s6, 256 }
 0x164   : > { %p2538_p3 = scmp.ne.s32.totalorder %s2241_s24, %s2537_s17  ;;  %p2542_p0 = scmp.lt.s32.totalorder %s2241_s24, %s3027_s6 }
 0x165   : > { %p2543_p6 = scmp.lt.s32.totalorder %s2541_s12, %s2537_s17 }
 0x166   : > { %p2539_p11 = pnand %p2538_p3, %p2710_p5 }
 0x167   : > { %p2544_p4 = por %p2543_p6, %p2542_p0 }
 0x168   : > { %p2540_p12 = pneg %p2539_p11 }
 0x16a   : > { %p2545_p10 = pnand %p2544_p4, %p2540_p12 }
 0x16c   : > { %2548 = shalt.err (!%p2545_p10)
}
 0x16d   : > { %2375 = dma.vmem_to_hbm [thread:$0]  (%p2710_p5), %s2244_s0, 128, %s2241_s24, %s2229_s29  }
 0x16e PF: > { %s2255_s26 = sand.u32 1, %s2589_s1   ;;  %p3035_p13 = scmp.ge.s32.totalorder %s2609_s10, 2 }
 0x16f   : > { %s2256_s28 = scalar_lea.sflag [#allocation7], %s2255_s26 }
 0x170   : > { %p2385_p9 = pnand %p3035_p13, %p2717_p7 }
 0x172   : > { %p2386_p1 = pneg %p2385_p9 }
 0x174   : > { %2584 = dma.done.wait (%p2386_p1), %s2256_s28, 128  }
 0x175   : > { %2586 = vsyncadd (%p2386_p1), %s2256_s28, 4294967168  ;;  %s35_s10 = sadd.s32 1, %s2609_s10   ;;  %s3036_s1 = smov %s2593_s30 }
 0x176   : > { %p32_p8 = scmp.ge.s32.totalorder %s35_s10, 4   ;;  %s3037_s30 = smov %s2597_s7 }
 0x177   : > { %s3038_s7 = smov %s2715_s19  ;;  %s3039_s8 = smov %s2605_s9 }
 0x178   : > { %s3040_s9 = smov %s3042_s13  ;;  %34 = sbr.rel (!%p32_p8) target bundleno = 33 (0x21), region = 94 }
 0x17d   :  { %2261 = vsyncpa [#allocation6], 1 }
 0x17e   :  { %2263 = vsyncpa [#allocation6 + $0x1], 1 }
 0x17f   :  { %2264 = vsyncpa [#allocation9], 1 }
 0x180   :  { %2266 = vsyncpa [#allocation9 + $0x1], 1 }
 0x181   :  { %2267 = vsyncpa [#allocation7], 1 }
 0x182   :  { %2269 = vsyncpa [#allocation7 + $0x1], 1 }

</bundles_post_ra>
